<compile_context>
chip_gen: v5e
topology: v5e:2x2
jax: 0.10.0
libtpu: 0.0.40
codegen_flags: <defaults>
</compile_context>

<pallas_src>
import functools

import jax
import jax.numpy as jnp
from jax.experimental import pallas as pl
from jax.experimental.pallas import tpu as pltpu


def _round_up(x, m):
    return (x + m - 1) // m * m


def maxout_kernel(x_ref, w_ref, b_ref, o_ref, acc_ref, *, d_out, pool_size):
    # x_ref:   [tB, tK]            (bf16)
    # w_ref:   [tK, pool*d_out]    (bf16, pool is the slow sub-dim of columns)
    # b_ref:   [1,  pool*d_out]    (f32)
    # o_ref:   [tB, d_out]         (f32)
    # acc_ref: [tB, pool*d_out]    (f32 scratch, resident across the K axis)
    k = pl.program_id(1)

    @pl.when(k == 0)
    def _():
        acc_ref[...] = jnp.zeros_like(acc_ref)

    acc_ref[...] += jnp.dot(x_ref[...], w_ref[...],
                            preferred_element_type=jnp.float32)

    @pl.when(k == pl.num_programs(1) - 1)
    def _():
        h = acc_ref[...] + b_ref[...]                      # [tB, pool*d_out]
        # Maxout: max over pool groups (static lane slices; pool is tiny).
        m = h[:, 0:d_out]
        for p in range(1, pool_size):
            m = jnp.maximum(m, h[:, p * d_out:(p + 1) * d_out])
        o_ref[...] = m


def maxout_forward(x, weight, bias, *, out_features, pool_size,
                   block_rows=256, block_k=512):
    """x: [..., d_in]; weight: [d_out*pool, d_in] (PyTorch layout); bias: [d_out*pool]."""
    d_in = x.shape[-1]
    lead = x.shape[:-1]
    pd = pool_size * out_features

    xf = x.reshape(-1, d_in)
    n = xf.shape[0]

    # Re-order Linear outputs so pool is the slow sub-dim: new col = p*d_out + o
    # (PyTorch's .view(..., d_out, pool) makes pool fast: old col = o*pool + p).
    # Also pre-transpose so the kernel computes y = x @ W + b.
    w3 = weight.reshape(out_features, pool_size, d_in)                    # [o, p, k]
    w_kernel = jnp.transpose(w3, (2, 1, 0)).reshape(d_in, pd)             # [k, p*d_out+o]
    b_kernel = jnp.transpose(bias.reshape(out_features, pool_size),
                             (1, 0)).reshape(1, pd)

    # bf16 operands for the MXU; bias / accumulation / elementwise stay f32.
    x_bf16 = xf.astype(jnp.bfloat16)
    w_bf16 = w_kernel.astype(jnp.bfloat16)
    b_f32 = b_kernel.astype(jnp.float32)

    # Row tiling: tile >= 8 sublanes, pad N up to a multiple of the tile.
    tb = min(block_rows, _round_up(n, 8))
    tb = _round_up(tb, 8)
    n_pad = _round_up(n, tb)

    # K tiling: single block if d_in is small, else 128-aligned K tiles.
    if d_in <= block_k:
        tk = d_in
        d_in_pad = d_in
    else:
        tk = block_k
        d_in_pad = _round_up(d_in, tk)

    if n_pad != n or d_in_pad != d_in:
        x_bf16 = jnp.pad(x_bf16, ((0, n_pad - n), (0, d_in_pad - d_in)))
    if d_in_pad != d_in:
        w_bf16 = jnp.pad(w_bf16, ((0, d_in_pad - d_in), (0, 0)))

    kernel = functools.partial(maxout_kernel, d_out=out_features,
                               pool_size=pool_size)
    y_pad = pl.pallas_call(
        kernel,
        out_shape=jax.ShapeDtypeStruct((n_pad, out_features), jnp.float32),
        grid=(n_pad // tb, d_in_pad // tk),
        in_specs=[
            pl.BlockSpec((tb, tk), lambda i, k: (i, k)),   # x rows: tiled over i, K over k
            pl.BlockSpec((tk, pd), lambda i, k: (k, 0)),   # W: tiled over K only
            pl.BlockSpec((1, pd), lambda i, k: (0, 0)),    # bias: resident
        ],
        out_specs=pl.BlockSpec((tb, out_features), lambda i, k: (i, 0)),
        scratch_shapes=[pltpu.VMEM((tb, pd), jnp.float32)],
        compiler_params=pltpu.CompilerParams(
            dimension_semantics=("parallel", "arbitrary")),
    )(x_bf16, w_bf16, b_f32)

    return y_pad[:n].reshape(lead + (out_features,))


def maxout_reference(x, weight, bias, out_features, pool_size):
    out = x @ weight.T + bias
    out = out.reshape(x.shape[:-1] + (out_features, pool_size))
    return jnp.max(out, axis=-1)


if __name__ == "__main__":
    # Small shapes implied by the module: batch=2, seq=8, in_features=32,
    # out_features=32, pool_size=4  ->  Linear output width 128 (lane dense).
    B, S = 2, 8
    d_in, d_out, pool = 32, 32, 4

    key = jax.random.PRNGKey(0)
    kx, kw, kb = jax.random.split(key, 3)
    x = jax.random.normal(kx, (B, S, d_in), jnp.float32)
    weight = jax.random.normal(kw, (d_out * pool, d_in), jnp.float32) * 0.1
    bias = jax.random.normal(kb, (d_out * pool,), jnp.float32) * 0.1

    # block_rows=8 so the toy case exercises a multi-step ("parallel") grid.
    y = maxout_forward(x, weight, bias, out_features=d_out, pool_size=pool,
                       block_rows=8)
    jax.block_until_ready(y)

    y_ref = maxout_reference(x, weight, bias, d_out, pool)
    assert y.shape == (B, S, d_out)
    assert jnp.allclose(y, y_ref, atol=5e-2, rtol=5e-2), float(
        jnp.max(jnp.abs(y - y_ref)))
    print("KERNEL_OK")
</pallas_src>

<mosaic_0001>
module attributes {stable_mosaic.version = 11 : i64} {
  func.func @maxout_kernel(%arg0: i32, %arg1: i32, %arg2: memref<8x32xbf16, #tpu.memory_space<vmem>>, %arg3: memref<32x128xbf16, #tpu.memory_space<vmem>>, %arg4: memref<1x128xf32, #tpu.memory_space<vmem>>, %arg5: memref<8x32xf32, #tpu.memory_space<vmem>>, %arg6: memref<8x128xf32, #tpu.memory_space<vmem>>) attributes {dimension_semantics = [#tpu.dimension_semantics<parallel>, #tpu.dimension_semantics<arbitrary>], iteration_bounds = array<i64: 2, 1>, scalar_prefetch = 0 : i64, scratch_operands = 1 : i64, tpu.core_type = #tpu.core_type<tc>, window_params = [{transform_indices = @transform_0, window_bounds = array<i64: 8, 32>}, {transform_indices = @transform_1, window_bounds = array<i64: 32, 128>}, {pipeline_mode = #tpu.pipeline_mode<synchronous>, transform_indices = @transform_2, window_bounds = array<i64: 1, 128>}, {transform_indices = @transform_3, window_bounds = array<i64: 8, 32>}]} {
    %c0_i32 = arith.constant 0 : i32
    %0 = arith.cmpi eq, %arg1, %c0_i32 : i32
    %1 = arith.extui %0 : i1 to i32
    %c0_i32_0 = arith.constant 0 : i32
    %2 = arith.cmpi ne, %1, %c0_i32_0 : i32
    scf.if %2 {
      %cst_10 = arith.constant 0.000000e+00 : f32
      %12 = vector.broadcast %cst_10 : f32 to vector<8x128xf32>
      %c0_11 = arith.constant 0 : index
      %c0_12 = arith.constant 0 : index
      %13 = vector.load %arg6[%c0_11, %c0_12] : memref<8x128xf32, #tpu.memory_space<vmem>>, vector<8x128xf32>
      tpu.vector_store %arg6[%c0_11, %c0_12], %12 {strides = array<i32>} : memref<8x128xf32, #tpu.memory_space<vmem>>, vector<8x128xf32>,
    } else {
    }
    %c0 = arith.constant 0 : index
    %c0_1 = arith.constant 0 : index
    %3 = vector.load %arg6[%c0, %c0_1] : memref<8x128xf32, #tpu.memory_space<vmem>>, vector<8x128xf32>
    %c0_2 = arith.constant 0 : index
    %c0_3 = arith.constant 0 : index
    %4 = vector.load %arg2[%c0_2, %c0_3] : memref<8x32xbf16, #tpu.memory_space<vmem>>, vector<8x32xbf16>
    %c0_4 = arith.constant 0 : index
    %c0_5 = arith.constant 0 : index
    %5 = vector.load %arg3[%c0_4, %c0_5] : memref<32x128xbf16, #tpu.memory_space<vmem>>, vector<32x128xbf16>
    %cst = arith.constant dense<0.000000e+00> : vector<8x128xf32>
    %6 = tpu.matmul %4, %5, %cst {dimension_numbers = #tpu.dot_dimension_numbers<[1], [0], [0], [1], [0, 0, 1, 1], [], []>} : vector<8x32xbf16>, vector<32x128xbf16>, vector<8x128xf32> -> vector<8x128xf32>
    %7 = arith.addf %3, %6 : vector<8x128xf32>
    %c0_6 = arith.constant 0 : index
    %c0_7 = arith.constant 0 : index
    %8 = vector.load %arg6[%c0_6, %c0_7] : memref<8x128xf32, #tpu.memory_space<vmem>>, vector<8x128xf32>
    tpu.vector_store %arg6[%c0_6, %c0_7], %7 {strides = array<i32>} : memref<8x128xf32, #tpu.memory_space<vmem>>, vector<8x128xf32>,
    %c0_i32_8 = arith.constant 0 : i32
    %9 = arith.cmpi eq, %arg1, %c0_i32_8 : i32
    %10 = arith.extui %9 : i1 to i32
    %c0_i32_9 = arith.constant 0 : i32
    %11 = arith.cmpi ne, %10, %c0_i32_9 : i32
    scf.if %11 {
      %c0_10 = arith.constant 0 : index
      %c0_11 = arith.constant 0 : index
      %12 = vector.load %arg6[%c0_10, %c0_11] : memref<8x128xf32, #tpu.memory_space<vmem>>, vector<8x128xf32>
      %c0_12 = arith.constant 0 : index
      %c0_13 = arith.constant 0 : index
      %13 = vector.load %arg4[%c0_12, %c0_13] : memref<1x128xf32, #tpu.memory_space<vmem>>, vector<1x128xf32>
      %14 = vector.broadcast %13 : vector<1x128xf32> to vector<8x128xf32>
      %15 = arith.addf %12, %14 : vector<8x128xf32>
      %16 = vector.extract_strided_slice %15 {offsets = [0, 0], sizes = [8, 32], strides = [1, 1]} : vector<8x128xf32> to vector<8x32xf32>
      %17 = vector.extract_strided_slice %15 {offsets = [0, 32], sizes = [8, 32], strides = [1, 1]} : vector<8x128xf32> to vector<8x32xf32>
      %18 = arith.maximumf %16, %17 : vector<8x32xf32>
      %19 = vector.extract_strided_slice %15 {offsets = [0, 64], sizes = [8, 32], strides = [1, 1]} : vector<8x128xf32> to vector<8x32xf32>
      %20 = arith.maximumf %18, %19 : vector<8x32xf32>
      %21 = vector.extract_strided_slice %15 {offsets = [0, 96], sizes = [8, 32], strides = [1, 1]} : vector<8x128xf32> to vector<8x32xf32>
      %22 = arith.maximumf %20, %21 : vector<8x32xf32>
      %c0_14 = arith.constant 0 : index
      %c0_15 = arith.constant 0 : index
      %23 = vector.load %arg5[%c0_14, %c0_15] : memref<8x32xf32, #tpu.memory_space<vmem>>, vector<8x32xf32>
      tpu.vector_store %arg5[%c0_14, %c0_15], %22 {strides = array<i32>} : memref<8x32xf32, #tpu.memory_space<vmem>>, vector<8x32xf32>,
    } else {
    }
    return
  }
  func.func @transform_0(%arg0: i32, %arg1: i32) -> (i32, i32) {
    %c0_i32 = arith.constant 0 : i32
    return %arg0, %arg1 : i32, i32
  }
  func.func @transform_1(%arg0: i32, %arg1: i32) -> (i32, i32) {
    %c0_i32 = arith.constant 0 : i32
    %c0_i32_0 = arith.constant 0 : i32
    return %arg1, %c0_i32 : i32, i32
  }
  func.func @transform_2(%arg0: i32, %arg1: i32) -> (i32, i32) {
    %c0_i32 = arith.constant 0 : i32
    %c0_i32_0 = arith.constant 0 : i32
    %c0_i32_1 = arith.constant 0 : i32
    return %c0_i32, %c0_i32_0 : i32, i32
  }
  func.func @transform_3(%arg0: i32, %arg1: i32) -> (i32, i32) {
    %c0_i32 = arith.constant 0 : i32
    %c0_i32_0 = arith.constant 0 : i32
    return %arg0, %c0_i32 : i32, i32
  }
}

</mosaic_0001>

<bundles_post_ra>
// kernel: tpu_custom_call.1
= control target key start
LH: loop header
LB: loop body
LE: loop exit
PB: predicated region body
PF: predicated region fallthrough
CT: control target
= control target key end

     0   :  { %8 = vsyncpa [#allocation4], 0  ;;  %s830_s0 = inlined_call_operand.hbm [shape: bf16[16,32], index: 0, kind: input, shape index: {}]   ;;  %s831_s1 = inlined_call_operand.hbm [shape: bf16[32,128], index: 1, kind: input, shape index: {}]   ;;  %s832_s2 = inlined_call_operand.vmem [shape: f32[1,128], index: 2, kind: input, shape index: {}]   ;;  %s833_s3 = inlined_call_operand.hbm [shape: f32[16,32], index: 3, kind: output, shape index: {}]  }
   0x1   :  { %10 = vsyncpa [#allocation4 + $0x1], 0 }
   0x2   :  { %11 = vsyncpa [#allocation7], 0 }
   0x3   :  { %12 = vsyncpa [#allocation5], 0 }
   0x4   :  { %14 = vsyncpa [#allocation5 + $0x1], 0  ;;  %s681_s12 = smov 0   ;;  %s683_s13 = smov 0  }
   0x5   :  { %s685_s14 = smov 0   ;;  %s687_s15 = smov 0  }
   0x6   :  { %s689_s16 = smov 0   ;;  %s691_s17 = smov 0  }
   0x7 LB: > { %s402_s18 = sadd.s32 4294967295, %s653_s17   ;;  %p404_p0 = scmp.ge.s32.totalorder %s653_s17, 1  ;;  %s653_s17 = sphi %s691_s17, %s20_s17   ;;  %s649_s16 = sphi %s689_s16, %s844_s16   ;;  %s645_s15 = sphi %s687_s15, %s843_s15   ;;  %s641_s14 = sphi %s685_s14, %s842_s14   ;;  %s637_s13 = sphi %s683_s13, %s841_s13   ;;  %s633_s12 = sphi %s681_s12, %s840_s12  }
   0x8   : > { %p713_p1 = scmp.eq.s32.totalorder %s402_s18, 0  ;;  %p138_p2 = scmp.lt.s32.totalorder %s653_s17, 3 }
   0x9   : > { %s152_s22 = sshll.u32 %s831_s1, 4  ;;  %s655_s24 = smov [#allocation6]   ;;  %s153_s22 = int_to_ptr.hbm [resolvable:$true] %s152_s22 }
   0xa   : > { %p721_p3 = pnand %p404_p0, %p138_p2  ;;  %s154_s25 = sshll.u32 %s655_s24, 4  ;;  %s155_s25 = int_to_ptr.vmem [resolvable:$true] %s154_s25 }
   0xb   : > { %p406_p6 = scmp.ge.s32.totalorder %s653_s17, 2  ;;  %s656_s26 = smov 64  }
   0xc   : > { %p436_p4 = pneg %p721_p3  ;;  %s657_s27 = smov 4  }
   0xd   : > { %s403_s28 = sadd.s32 4294967294, %s653_s17   ;;  %s32_s29 = sadd.s32 1, %s649_s16 }
   0xe   : > { %p437_p5 = pnand %p436_p4, %p713_p1  ;;  %s41_s30 = sadd.s32 1, %s641_s14 }
   0xf   : > { %p34_p7 = scmp.ge.s32.totalorder %s32_s29, 2  ;;  %p48_p8 = scmp.ne.s32.totalorder %s641_s14, %s637_s13 }
  0x10   : > { %439 = dma.hbm_to_vmem [thread:$0]  (!%p437_p5), %s153_s22, 256, %s155_s25, [#allocation7], %s656_s26, %s656_s26, %s657_s27  }
  0x11   : > { %p49_p9 = scmp.eq.s32.totalorder %s653_s17, 0  ;;  %p54_p10 = scmp.ne.s32.totalorder %s637_s13, %s633_s12 }
  0x12   : > { %s846_s29 = smov (%p34_p7, %s32_s29), 0  ;;  %p125_p13 = scmp.eq.s32.totalorder %s402_s18, 1 }
  0x13   : > { %p740_p11 = por %p49_p9, %p48_p8  ;;  %p746_p12 = por %p713_p1, %p54_p10 }
  0x14   : > { %s36_s6 = ssub.s32 %s649_s16, %s846_s29  ;;  %p131_p2 = scmp.eq.s32.totalorder %s403_s28, 1 }
  0x15   : > { %p39_p0 = scmp.eq.s32.totalorder %s36_s6, 0  ;;  %p752_p4 = por %p125_p13, %p48_p8 }
  0x16   : > { %p449_p5 = scmp.lt.s32.totalorder %s653_s17, 2  ;;  %p760_p7 = por %p131_p2, %p54_p10 }
  0x17   : > { %s758_s8 = scalar_select %p39_p0, %s641_s14, %s41_s30  }
  0x18   : > { %s171_s10 = sand.u32 1, %s641_s14   ;;  %s408_s20 = sshll.u32 %s649_s16, 2 }
  0x19   : > { %s407_s11 = sshll.u32 %s171_s10, 2  ;;  %s180_s18 = scalar_lea.hbm %s830_s0, %s408_s20 }
  0x1a   : > { %s175_s24 = scalar_lea.vmem [#allocation3], %s407_s11  ;;  %s182_s26 = sshll.u32 %s180_s18, 4  ;;  %s183_s26 = int_to_ptr.hbm [resolvable:$true] %s182_s26 }
  0x1b   : > { %s184_s25 = sshll.u32 %s175_s24, 4  ;;  %p441_p8 = pnand %p449_p5, %p740_p11  ;;  %s185_s25 = int_to_ptr.vmem [resolvable:$true] %s184_s25 }
  0x1c   : > { %s172_s27 = scalar_lea.sflag [#allocation4], %s171_s10  ;;  %193 = sbr.rel (%p721_p3) target bundleno = 302 (0x12e), region = 32 }
  0x1d   : > { %443 = dma.hbm_to_vmem [thread:$0]  (!%p441_p8), %s183_s26, 64, %s185_s25, %s172_s27  }
  0x1e   : > { %s774_s28 = sand.u32 (!%p721_p3), 1, %s637_s13  }
  0x1f   : > { %s410_s30 = sshll.u32 (!%p721_p3), %s774_s28, 2  ;;  %s196_s6 = scalar_lea.sflag (!%p721_p3), [#allocation4], %s774_s28 }
  0x20   : > { %s199_s11 = scalar_lea.vmem (!%p721_p3), [#allocation3], %s410_s30 }
  0x21   : > { %620 = dma.done.wait (%p746_p12), %s196_s6, 64  }
  0x22   : > { %622 = vsyncadd (%p746_p12), %s196_s6, 4294967232 }
  0x23   : > { %624 = dma.done.wait (%p713_p1), [#allocation7], 256  }
  0x24   : > { %626 = vsyncadd (%p713_p1), [#allocation7], 4294967040  ;;  %v427_v0 = vld [vmem:[#allocation6 + $0x8] sm:$0xff]  ;;  %v426_v1 = vld [vmem:[#allocation6] sm:$0xff]  ;;  %vm253_vm0 = vcmask 261120   ;;  %s658_s5 = smov 32  }
  0x25   : > { %263 = vmatpush.bf16.msra.mxu0 %v427_v0  ;;  %v236_v2 = vld [vmem:[%s199_s11] sm:$0xf]  ;;  %s659_s19 = smov 96   ;;  %s660_s10 = smov 64  }
  0x26   : > { %v506_v3 = vld [vmem:[%s832_s2] ss:$0 sm:$0xff]  ;;  %s412_s20 = sshll.u32 %s774_s28, 3  ;;  %s423_s21 = sshll.u32 %s645_s15, 3 }
  0x27   : > { %s306_s24 = scalar_lea.hbm %s833_s3, %s423_s21  ;;  %s227_s25 = scalar_lea.vmem [#allocation8], %s412_s20 }
  0x28   : > { %s308_s26 = sshll.u32 %s227_s25, 4  ;;  %s310_s27 = sshll.u32 %s306_s24, 4  ;;  %s309_s26 = int_to_ptr.vmem [resolvable:$true] %s308_s26  ;;  %s311_s27 = int_to_ptr.hbm [resolvable:$true] %s310_s27 }
  0x29   : > { %264 = vmatpush.bf16.msra.mxu0 %v426_v1  ;;  %s296_s30 = scalar_lea.sflag [#allocation5], %s774_s28  ;;  %s581_s6 = sshra.s32 %s311_s27, 4  ;;  %s582_s6 = int_to_ptr.hbm [resolvable:$true] %s581_s6 }
  0x2a   : > { %s583_s15 = scalar_lea.hbm %s582_s6, 8  ;;  %s587_s4 = scalar_lea.hbm %s833_s3, 16 }
  0x2b   : > { %p584_p1 = scmp.ne.s32.totalorder %s582_s6, %s583_s15  ;;  %p588_p10 = scmp.lt.s32.totalorder %s582_s6, %s833_s3 }
  0x2c   : > { %421 = vmatmul.msk.bf16.vlgmr.msra.gmra.mxu0 %vm253_vm0, %v236_v2  ;;  %p589_p11 = scmp.lt.s32.totalorder %s587_s4, %s583_s15 }
  0x2d   : > { %p585_p3 = pnand %p584_p1, %p752_p4 }
  0x2e   : > { %p590_p12 = por %p589_p11, %p588_p10 }
  0x2f   : > { %p586_p9 = pneg %p585_p3 }
  0x31   : > { %p591_p13 = pnand %p590_p12, %p586_p9 }
  0xa9   : > { %v266_v4 = vpop.f32.mrf.mxu0 }
  0xaa   : > { %v280_v5 = vadd.f32 %v506_v3, %v266_v4 }
  0xac   : > { %290 = vrot.lane.b32.xlu1 %v280_v5, %s658_s5  ;;  %282 = vrot.lane.b32.xlu0 %v280_v5, %s659_s19 }
  0xb1   : > { %v268_v6 = vpop.f32.mrf.mxu0 }
  0xb4   : > { %286 = vrot.lane.b32.xlu0 %v280_v5, %s660_s10 }
 0x11e   : > { %v283_v7 = vpop.permute.xlu0 %282  ;;  %v291_v11 = vpop.permute.xlu1 %290 }
 0x11f   : > { %v285_v8 = vmax.f32 %v280_v5, %v283_v7 }
 0x126   : > { %v287_v9 = vpop.permute.xlu0 %286 }
 0x127   : > { %v289_v10 = vmax.f32 %v285_v8, %v287_v9 }
 0x129   : > { %v293_v12 = vmax.f32 %v289_v10, %v291_v11 }
 0x12b   : > { %294 = vst.msk [vmem:[%s227_s25] sm:$0xff] %vm253_vm0, %v293_v12 }
 0x12c   : > { %594 = shalt.err (!%p591_p13)
}
 0x12d   : > { %434 = dma.vmem_to_hbm [thread:$0]  (%p752_p4), %s309_s26, 128, %s311_s27, %s296_s30  }
 0x12e PF: > { %s322_s28 = sand.u32 1, %s633_s12   ;;  %p445_p0 = pnand %p406_p6, %p760_p7 }
 0x12f   : > { %s323_s10 = scalar_lea.sflag [#allocation5], %s322_s28 }
 0x130   : > { %p446_p2 = pneg %p445_p0 }
 0x132   : > { %628 = dma.done.wait (%p446_p2), %s323_s10, 128  }
 0x133   : > { %630 = vsyncadd (%p446_p2), %s323_s10, 4294967168  ;;  %s20_s17 = sadd.s32 1, %s653_s17   ;;  %s840_s12 = smov %s637_s13 }
 0x134   : > { %p17_p5 = scmp.ge.s32.totalorder %s20_s17, 4   ;;  %s841_s13 = smov %s641_s14 }
 0x135   : > { %s842_s14 = smov %s758_s8  ;;  %s843_s15 = smov %s649_s16 }
 0x136   : > { %s844_s16 = smov %s846_s29  ;;  %19 = sbr.rel (!%p17_p5) target bundleno = 7 (0x7), region = 90 }
 0x13b   :  { %329 = vsyncpa [#allocation4], 1 }
 0x13c   :  { %331 = vsyncpa [#allocation4 + $0x1], 1 }
 0x13d   :  { %332 = vsyncpa [#allocation7], 1 }
 0x13e   :  { %333 = vsyncpa [#allocation5], 1 }
 0x13f   :  { %335 = vsyncpa [#allocation5 + $0x1], 1 }

</bundles_post_ra>
